<compile_context>
chip_gen: v5e
topology: v5e:2x2
jax: 0.10.0
libtpu: 0.0.40
codegen_flags: <defaults>
</compile_context>

<pallas_src>
import functools

import jax
import jax.numpy as jnp
from jax import lax
from jax.experimental import pallas as pl
from jax.experimental.pallas import tpu as pltpu

LANE = 128
SUBLANE = 8
ALIGN = SUBLANE * LANE  # 1024-element alignment unit handled by the kernel


def _round_up(x, m):
    return ((x + m - 1) // m) * m


def _tensorcore_split():
    """Return (num_cores, is_v7) for the leading 'core' grid axis."""
    try:
        kind = jax.devices()[0].device_kind.lower()
    except Exception:
        return 1, False
    is_v7 = ("v7" in kind) or ("7x" in kind)
    megacore = ("v5p" in kind) or (
        "v4" in kind and "lite" not in kind and "v4i" not in kind
    )
    if is_v7 or megacore:
        return 2, is_v7
    return 1, False  # v5e / v6e / unknown: single TensorCore


def _l1_sum_kernel(p_ref, t_ref, o_ref, acc_ref, *, rows_total, need_mask):
    c = pl.program_id(0)
    i = pl.program_id(1)
    blocks_per_core = pl.num_programs(1)
    tile_rows = p_ref.shape[0]

    @pl.when(i == 0)
    def _():
        acc_ref[...] = jnp.zeros_like(acc_ref)

    # f32 diff for numerics parity with nn.L1Loss regardless of input dtype.
    diff = jnp.abs(p_ref[...].astype(jnp.float32) - t_ref[...].astype(jnp.float32))

    def accumulate(d):
        # Sublane-grouped partial reduce: pure VPU adds into a vreg-shaped
        # accumulator; no cross-lane (XLU) work in the hot loop.
        acc_ref[...] += d.reshape(tile_rows // SUBLANE, SUBLANE, LANE).sum(axis=0)

    if need_mask:
        # Logical (UNCLAMPED) block index -> first row of this block, so
        # clamped duplicate blocks are never double-counted.
        row_base = (c * blocks_per_core + i) * tile_rows
        is_interior = row_base + tile_rows <= rows_total

        @pl.when(is_interior)
        def _():
            accumulate(diff)  # hot path: no mask work

        @pl.when(jnp.logical_not(is_interior))
        def _():
            # Edge block (partial rows / clamped duplicate): mask by logical
            # row id. Garbage rows past the array edge select 0.0 here.
            row_ids = row_base + lax.broadcasted_iota(
                jnp.int32, (tile_rows, LANE), 0
            )
            accumulate(jnp.where(row_ids < rows_total, diff, 0.0))
    else:
        accumulate(diff)

    @pl.when(i == blocks_per_core - 1)
    def _():
        o_ref[...] = acc_ref[...].reshape(1, SUBLANE, LANE)


def l1_loss(predictions, targets, *, tile_rows=8192):
    """Mean of |predictions - targets| over all elements (nn.L1Loss default)."""
    assert predictions.shape == targets.shape, "L1Loss expects matching shapes"
    n = predictions.size
    orig_dtype = predictions.dtype
    itemsize = jnp.dtype(orig_dtype).itemsize

    p_flat = predictions.reshape(-1)
    t_flat = targets.reshape(-1)

    # Kernel consumes the 1024-aligned prefix; the ragged tail (< 1024 elems)
    # is a trivial plain-JAX reduction. This avoids the jnp.pad pass that
    # re-streamed both full operands through HBM.
    n_aligned = (n // ALIGN) * ALIGN
    tail = n - n_aligned
    tail_sum = jnp.float32(0.0)
    if tail:
        tail_sum = jnp.sum(
            jnp.abs(
                p_flat[n_aligned:].astype(jnp.float32)
                - t_flat[n_aligned:].astype(jnp.float32)
            )
        )

    if n_aligned == 0:
        # Fewer than 1024 elements: a kernel launch is pointless.
        loss = tail_sum / jnp.float32(n)
        return loss.astype(orig_dtype)

    rows_total = n_aligned // LANE  # multiple of SUBLANE by construction

    # --- tile selection ------------------------------------------------------
    # Multi-MiB blocks: 8192 rows -> 4 MiB/block/input in f32 (16 MiB double
    # buffered for both inputs), clamped to the data size for small inputs.
    tile_rows = max(SUBLANE, min(tile_rows, rows_total))
    tile_rows = _round_up(tile_rows, SUBLANE)
    blocks_total = pl.cdiv(rows_total, tile_rows)

    # --- TensorCore split ----------------------------------------------------
    num_cores, is_v7 = _tensorcore_split()
    if blocks_total < num_cores:
        num_cores = 1  # never duplicate-read small inputs
    if num_cores > 1 and blocks_total % num_cores != 0:
        # Prefer shrinking the tile so the block count splits evenly across
        # cores (avoids a wasted full-block duplicate DMA on the last core).
        bpc = pl.cdiv(blocks_total, num_cores)
        alt = _round_up(pl.cdiv(rows_total, num_cores * bpc), SUBLANE)
        if alt >= SUBLANE and pl.cdiv(rows_total, alt) % num_cores == 0:
            tile_rows = alt
            blocks_total = pl.cdiv(rows_total, tile_rows)

    blocks_per_core = pl.cdiv(blocks_total, num_cores)
    clamp_needed = blocks_per_core * num_cores != blocks_total
    need_mask = clamp_needed or (rows_total % tile_rows != 0)
    last_block = blocks_total - 1

    # Free row-major reshape to a lane-dense (rows, 128) slab (no copy).
    p2 = p_flat[:n_aligned].reshape(rows_total, LANE) if tail else p_flat.reshape(
        rows_total, LANE
    )
    t2 = t_flat[:n_aligned].reshape(rows_total, LANE) if tail else t_flat.reshape(
        rows_total, LANE
    )

    def in_map(c, i):
        b = c * blocks_per_core + i
        if clamp_needed:
            # Clamp so every DMA stays in bounds; clamped duplicates are
            # masked out inside the kernel by their logical row index.
            b = jnp.minimum(b, last_block)
        return (b, 0)

    # --- VMEM budget ---------------------------------------------------------
    # 2 inputs x 2 pipeline buffers + the materialized f32 diff + headroom.
    block_bytes = tile_rows * LANE * itemsize
    vmem_need = 2 * 2 * block_bytes + tile_rows * LANE * 4 + (4 << 20)
    # Cap below v7x's 64 MiB physical VMEM; floor at the common 32 MiB scoped
    # default (raises v5e's 16 MiB default so large f32 tiles are accepted).
    vmem_limit = int(min(max(vmem_need * 2, 32 << 20), 48 << 20))

    # On v7x only CORE_PARALLEL is guaranteed to shard the axis across the two
    # TensorCores; on megacore v4/v5p plain "parallel" does the split.
    leading_sem = pltpu.CORE_PARALLEL if (num_cores > 1 and is_v7) else "parallel"

    kernel = functools.partial(
        _l1_sum_kernel, rows_total=rows_total, need_mask=need_mask
    )

    partial_sums = pl.pallas_call(
        kernel,
        out_shape=jax.ShapeDtypeStruct((num_cores, SUBLANE, LANE), jnp.float32),
        grid_spec=pltpu.PrefetchScalarGridSpec(
            num_scalar_prefetch=0,
            grid=(num_cores, blocks_per_core),
            in_specs=[
                pl.BlockSpec((tile_rows, LANE), in_map),
                pl.BlockSpec((tile_rows, LANE), in_map),
            ],
            out_specs=pl.BlockSpec((1, SUBLANE, LANE), lambda c, i: (c, 0, 0)),
            scratch_shapes=[pltpu.VMEM((SUBLANE, LANE), jnp.float32)],
        ),
        compiler_params=pltpu.CompilerParams(
            dimension_semantics=(leading_sem, "arbitrary"),
            vmem_limit_bytes=vmem_limit,
        ),
    )(p2, t2)

    loss = (jnp.sum(partial_sums) + tail_sum) / jnp.float32(n)
    return loss.astype(orig_dtype)


if __name__ == "__main__":
    key = jax.random.PRNGKey(0)
    kp, kt = jax.random.split(key)
    # Small NCHW shapes consistent with a conv-style pipeline.
    predictions = jax.random.normal(kp, (2, 4, 16, 16), dtype=jnp.float32)
    targets = jax.random.normal(kt, (2, 4, 16, 16), dtype=jnp.float32)

    loss = l1_loss(predictions, targets)
    jax.block_until_ready(loss)

    # Sanity check against plain-JAX reference.
    ref = jnp.mean(jnp.abs(predictions - targets))
    assert jnp.allclose(loss, ref, rtol=1e-5, atol=1e-6), (loss, ref)

    print("KERNEL_OK")
</pallas_src>

<mosaic_0001>
module attributes {stable_mosaic.version = 11 : i64} {
  func.func @_l1_sum_kernel(%arg0: i32, %arg1: i32, %arg2: memref<16x128xf32, #tpu.memory_space<vmem>>, %arg3: memref<16x128xf32, #tpu.memory_space<vmem>>, %arg4: memref<1x8x128xf32, #tpu.memory_space<vmem>>, %arg5: memref<8x128xf32, #tpu.memory_space<vmem>>) attributes {dimension_semantics = [#tpu.dimension_semantics<parallel>, #tpu.dimension_semantics<arbitrary>], iteration_bounds = array<i64: 1, 1>, scalar_prefetch = 0 : i64, scratch_operands = 1 : i64, tpu.core_type = #tpu.core_type<tc>, window_params = [{transform_indices = @transform_0, window_bounds = array<i64: 16, 128>}, {transform_indices = @transform_1, window_bounds = array<i64: 16, 128>}, {transform_indices = @transform_2, window_bounds = array<i64: 1, 8, 128>}]} {
    %c0_i32 = arith.constant 0 : i32
    %0 = arith.cmpi eq, %arg1, %c0_i32 : i32
    %1 = arith.extui %0 : i1 to i32
    %c0_i32_0 = arith.constant 0 : i32
    %2 = arith.cmpi ne, %1, %c0_i32_0 : i32
    scf.if %2 {
      %cst_10 = arith.constant 0.000000e+00 : f32
      %15 = vector.broadcast %cst_10 : f32 to vector<8x128xf32>
      %c0_11 = arith.constant 0 : index
      %c0_12 = arith.constant 0 : index
      %16 = vector.load %arg5[%c0_11, %c0_12] : memref<8x128xf32, #tpu.memory_space<vmem>>, vector<8x128xf32>
      tpu.vector_store %arg5[%c0_11, %c0_12], %15 {strides = array<i32>} : memref<8x128xf32, #tpu.memory_space<vmem>>, vector<8x128xf32>,
    } else {
    }
    %c0 = arith.constant 0 : index
    %c0_1 = arith.constant 0 : index
    %3 = vector.load %arg2[%c0, %c0_1] : memref<16x128xf32, #tpu.memory_space<vmem>>, vector<16x128xf32>
    %c0_2 = arith.constant 0 : index
    %c0_3 = arith.constant 0 : index
    %4 = vector.load %arg3[%c0_2, %c0_3] : memref<16x128xf32, #tpu.memory_space<vmem>>, vector<16x128xf32>
    %5 = arith.subf %3, %4 : vector<16x128xf32>
    %6 = math.absf %5 : vector<16x128xf32>
    %c0_4 = arith.constant 0 : index
    %c0_5 = arith.constant 0 : index
    %7 = vector.load %arg5[%c0_4, %c0_5] : memref<8x128xf32, #tpu.memory_space<vmem>>, vector<8x128xf32>
    %8 = vector.shape_cast %6 : vector<16x128xf32> to vector<2x8x128xf32>
    %cst = arith.constant dense<0.000000e+00> : vector<8x128xf32>
    %9 = vector.multi_reduction <add>, %8, %cst [0] : vector<2x8x128xf32> to vector<8x128xf32>
    %10 = arith.addf %7, %9 : vector<8x128xf32>
    %c0_6 = arith.constant 0 : index
    %c0_7 = arith.constant 0 : index
    %11 = vector.load %arg5[%c0_6, %c0_7] : memref<8x128xf32, #tpu.memory_space<vmem>>, vector<8x128xf32>
    tpu.vector_store %arg5[%c0_6, %c0_7], %10 {strides = array<i32>} : memref<8x128xf32, #tpu.memory_space<vmem>>, vector<8x128xf32>,
    %c0_i32_8 = arith.constant 0 : i32
    %12 = arith.cmpi eq, %arg1, %c0_i32_8 : i32
    %13 = arith.extui %12 : i1 to i32
    %c0_i32_9 = arith.constant 0 : i32
    %14 = arith.cmpi ne, %13, %c0_i32_9 : i32
    scf.if %14 {
      %c0_10 = arith.constant 0 : index
      %c0_11 = arith.constant 0 : index
      %15 = vector.load %arg5[%c0_10, %c0_11] : memref<8x128xf32, #tpu.memory_space<vmem>>, vector<8x128xf32>
      %16 = vector.shape_cast %15 : vector<8x128xf32> to vector<1x8x128xf32>
      %c0_12 = arith.constant 0 : index
      %c0_13 = arith.constant 0 : index
      %c0_14 = arith.constant 0 : index
      %17 = vector.load %arg4[%c0_12, %c0_13, %c0_14] : memref<1x8x128xf32, #tpu.memory_space<vmem>>, vector<1x8x128xf32>
      tpu.vector_store %arg4[%c0_12, %c0_13, %c0_14], %16 {strides = array<i32>} : memref<1x8x128xf32, #tpu.memory_space<vmem>>, vector<1x8x128xf32>,
    } else {
    }
    return
  }
  func.func @transform_0(%arg0: i32, %arg1: i32) -> (i32, i32) {
    %c1_i32 = arith.constant 1 : i32
    %0 = arith.muli %arg0, %c1_i32 : i32
    %1 = arith.addi %0, %arg1 : i32
    %c0_i32 = arith.constant 0 : i32
    %c0_i32_0 = arith.constant 0 : i32
    return %1, %c0_i32 : i32, i32
  }
  func.func @transform_1(%arg0: i32, %arg1: i32) -> (i32, i32) {
    %c1_i32 = arith.constant 1 : i32
    %0 = arith.muli %arg0, %c1_i32 : i32
    %1 = arith.addi %0, %arg1 : i32
    %c0_i32 = arith.constant 0 : i32
    %c0_i32_0 = arith.constant 0 : i32
    return %1, %c0_i32 : i32, i32
  }
  func.func @transform_2(%arg0: i32, %arg1: i32) -> (i32, i32, i32) {
    %c0_i32 = arith.constant 0 : i32
    %c0_i32_0 = arith.constant 0 : i32
    %c0_i32_1 = arith.constant 0 : i32
    return %arg0, %c0_i32, %c0_i32_0 : i32, i32, i32
  }
}

</mosaic_0001>

<bundles_post_ra>
// kernel: tpu_custom_call.1
= control target key start
LH: loop header
LB: loop body
LE: loop exit
PB: predicated region body
PF: predicated region fallthrough
CT: control target
= control target key end

     0   :  { %7 = vsyncpa [#allocation4], 0  ;;  %s208_s0 = inlined_call_operand.hbm [shape: f32[16,128], index: 0, kind: input, shape index: {}]   ;;  %s209_s1 = inlined_call_operand.hbm [shape: f32[16,128], index: 1, kind: input, shape index: {}]   ;;  %s210_s2 = inlined_call_operand.hbm [shape: f32[1,8,128], index: 2, kind: output, shape index: {}]  }
   0x1   :  { %8 = vsyncpa [#allocation7], 0 }
   0x2   :  { %9 = vsyncpa [#allocation5], 0  ;;  %s18_s11 = sshll.u32 %s208_s0, 4  ;;  %s179_s12 = smov [#allocation3]   ;;  %s19_s11 = int_to_ptr.hbm [resolvable:$true] %s18_s11 }
   0x3   :  { %s20_s13 = sshll.u32 %s179_s12, 4  ;;  %s35_s16 = sshll.u32 %s209_s1, 4  ;;  %s21_s13 = int_to_ptr.vmem [resolvable:$true] %s20_s13  ;;  %s36_s16 = int_to_ptr.hbm [resolvable:$true] %s35_s16 }
   0x4   :  { %s180_s17 = smov 128   ;;  %s181_s18 = smov 8  }
   0x5   :  { %26 = dma.hbm_to_vmem [thread:$0]  %s19_s11, 256, %s21_s13, [#allocation4], %s180_s17, %s180_s17, %s181_s18  }
   0x6   :  { %s182_s19 = smov [#allocation6]  }
   0x7   :  { %s37_s20 = sshll.u32 %s182_s19, 4  ;;  %s38_s20 = int_to_ptr.vmem [resolvable:$true] %s37_s20 }
   0x8   :  { %43 = dma.hbm_to_vmem [thread:$0]  %s36_s16, 256, %s38_s20, [#allocation7], %s180_s17, %s180_s17, %s181_s18  }
   0x9   :  { %173 = dma.done.wait [#allocation4], 256  }
   0xa   :  { %174 = vsyncadd [#allocation4], 4294967040 }
   0xb   :  { %175 = dma.done.wait [#allocation7], 256  }
   0xc   :  { %176 = vsyncadd [#allocation7], 4294967040  ;;  %v61_v0 = vld [vmem:[#allocation3] sm:$0xff]  ;;  %v62_v1 = vld [vmem:[#allocation3 + $0x8] sm:$0xff]  ;;  %s183_s0 = smov [#allocation8]   ;;  %s85_s23 = sshll.u32 %s210_s2, 4  ;;  %s86_s23 = int_to_ptr.hbm [resolvable:$true] %s85_s23 }
   0xd   :  { %v63_v2 = vld [vmem:[#allocation6] sm:$0xff]  ;;  %v64_v3 = vld [vmem:[#allocation6 + $0x8] sm:$0xff]  ;;  %s83_s1 = sshll.u32 %s183_s0, 4  ;;  %s84_s1 = int_to_ptr.vmem [resolvable:$true] %s83_s1 }
   0xe   :  { %v65_v4 = vsub.f32 %v61_v0, %v63_v2  ;;  %v66_v5 = vsub.f32 %v62_v1, %v64_v3 }
  0x10   :  { %v67_v6 = vand.u32 2147483647, %v65_v4  ;;  %v68_v7 = vand.u32 2147483647, %v66_v5 }
  0x12   :  { %v70_v8 = vadd.f32 %v68_v7, %v67_v6 }
  0x14   :  { %77 = vst [vmem:[#allocation8] sm:$0xff] %v70_v8 }
  0x15   :  { %88 = dma.vmem_to_hbm [thread:$0]  %s84_s1, 128, %s86_s23, [#allocation5]  }
  0x16   :  { %177 = dma.done.wait [#allocation5], 128  }
  0x17   :  { %178 = vsyncadd [#allocation5], 4294967168 }
  0x18   :  { %93 = vsyncpa [#allocation4], 1 }
  0x19   :  { %94 = vsyncpa [#allocation7], 1 }
  0x1a   :  { %95 = vsyncpa [#allocation5], 1 }

</bundles_post_ra>
